<compile_context>
chip_gen: v5e
topology: v5e:2x2
jax: 0.10.0
libtpu: 0.0.40
codegen_flags: <defaults>
</compile_context>

<pallas_src>
import functools

import jax
import jax.numpy as jnp
from jax import lax
from jax.experimental import pallas as pl
from jax.experimental.pallas import tpu as pltpu


def _eloc_kernel(x_ref, w_ref, out_ref, acc_ref, *,
                 total_rows, tm, tiles_per_part, num_tiles, ragged):
    """One (partition p, row-tile t) grid step.

    acc_ref is a single (8, D) f32 vreg-tile accumulator: per step only the
    MXU matmul plus elementwise VPU subtract/adds run.  The partition's partial
    is written once, at its last row tile, as a lane-dense (8, D) block.
    """
    t = pl.program_id(1)

    @pl.when(t == 0)
    def _init():
        acc_ref[...] = jnp.zeros_like(acc_ref)

    xv = x_ref[...]                                        # (tm, D), input dtype
    x = xv.astype(jnp.float32)
    # H(x) = x @ W on the MXU: narrow operands, f32 accumulation.
    hx = jnp.dot(xv.astype(w_ref.dtype), w_ref[...],
                 preferred_element_type=jnp.float32)
    diff = x - hx                                          # (tm, D) f32, pure VPU

    def _fold(v):
        # Fold (tm, D) into the (8, D) accumulator: elementwise adds only
        # (no cross-lane / XLU work).
        acc_ref[...] += v.reshape(tm // 8, 8, -1).sum(axis=0)

    if ragged:
        gt = pl.program_id(0) * tiles_per_part + t         # global tile index
        is_last_tile = gt == (num_tiles - 1)

        @pl.when(jnp.logical_not(is_last_tile))
        def _full_tile():
            _fold(diff)

        @pl.when(is_last_tile)
        def _partial_tile():
            # Zero rows past the end of the array (block-padding garbage).
            valid = total_rows - gt * tm
            rows = lax.broadcasted_iota(jnp.int32, diff.shape, 0)
            _fold(jnp.where(rows < valid, diff, 0.0))
    else:
        _fold(diff)

    @pl.when(t == pl.num_programs(1) - 1)
    def _finalize():
        out_ref[0] = acc_ref[...]                          # lane-dense (8, D) store


def elocal_loss(x, w, *, tm=None, num_partitions=None,
                matmul_dtype=jnp.bfloat16):
    """loss = sum(x - x @ w), fused in a single Pallas kernel."""
    M, D = x.shape
    assert w.shape == (D, D)

    try:
        vmem_cap = int(pltpu.get_tpu_info().vmem_capacity_bytes)
    except Exception:
        vmem_cap = 64 * 1024 * 1024          # v7x per-TC size (conservative)

    itemsize = x.dtype.itemsize

    # --- row-tile selection: ~40% of per-core VMEM for the x double-buffer,
    #     capped at 8192 rows (multi-MiB DMAs amortize the ~0.35 us/step cost).
    if tm is None:
        budget = int(0.40 * vmem_cap)
        tm = budget // (2 * D * itemsize)
        tm = max(8, min(8192, (tm // 8) * 8))
    tm = max(8, (int(tm) // 8) * 8)
    if M <= tm:                              # tiny problem: single grid step
        tm = max(8, ((M + 7) // 8) * 8)

    num_tiles = pl.cdiv(M, tm)

    # --- optional partition split (one partition per v7x TensorCore).
    if num_partitions is None:
        if num_tiles >= 4 and num_tiles % 2 != 0:
            # Nudge tm down slightly so the tile count is even and both
            # TensorCores get equal work.
            tm_even = max(8, ((pl.cdiv(M, num_tiles + 1) + 7) // 8) * 8)
            if pl.cdiv(M, tm_even) % 2 == 0:
                tm, num_tiles = tm_even, pl.cdiv(M, tm_even)
        num_partitions = 2 if (num_tiles >= 4 and num_tiles % 2 == 0) else 1
    P = max(1, int(num_partitions))
    while num_tiles % P != 0:                # graceful fallback, never assert
        P -= 1
    tiles_per_part = num_tiles // P
    ragged = (M % tm) != 0

    w_mm = w.astype(matmul_dtype)

    kernel = functools.partial(
        _eloc_kernel, total_rows=M, tm=tm, tiles_per_part=tiles_per_part,
        num_tiles=num_tiles, ragged=ragged)

    # --- VMEM budget: x double-buffer + W double-buffer + f32 temporaries of
    #     the compute chain (x, hx, diff, fold) + acc/out blocks + headroom,
    #     clamped to 80% of the queried per-core capacity.
    need = (2 * tm * D * itemsize                              # x pipeline
            + 2 * D * D * jnp.dtype(matmul_dtype).itemsize     # resident W
            + 4 * tm * D * 4                                   # f32 temporaries
            + 4 * 8 * D * 4)                                   # acc + out blocks
    vmem_limit = int(min(0.8 * vmem_cap, max(need + (16 << 20), 32 << 20)))

    partials = pl.pallas_call(
        kernel,
        out_shape=jax.ShapeDtypeStruct((P, 8, D), jnp.float32),
        grid_spec=pltpu.PrefetchScalarGridSpec(
            num_scalar_prefetch=0,
            grid=(P, tiles_per_part),
            in_specs=[
                # x row tile for (partition, tile) step.
                pl.BlockSpec((tm, D), lambda p, t: (p * tiles_per_part + t, 0)),
                # Full W, constant index (resident across the whole grid).
                pl.BlockSpec((D, D), lambda p, t: (0, 0)),
            ],
            # One lane-dense (8, D) partial per partition, written once at the
            # partition's last row tile.
            out_specs=pl.BlockSpec((1, 8, D), lambda p, t: (p, 0, 0)),
            scratch_shapes=[pltpu.VMEM((8, D), jnp.float32)],
        ),
        compiler_params=pltpu.CompilerParams(
            dimension_semantics=("parallel", "arbitrary"),
            vmem_limit_bytes=vmem_limit,
        ),
    )(x, w_mm)

    # Tiny (P, 8, D) partials -> scalar loss: one XLA reduce in the wrapper.
    return jnp.sum(partials)


if __name__ == "__main__":
    key = jax.random.PRNGKey(0)
    kx, kw, kx2 = jax.random.split(key, 3)

    # --- benchmark-size problem: collapses to a single grid step ------------
    M, D = 64, 128
    x = jax.random.normal(kx, (M, D), dtype=jnp.float32)
    w = 0.01 * jax.random.normal(kw, (D, D), dtype=jnp.float32)

    loss = elocal_loss(x, w)
    jax.block_until_ready(loss)
    ref = jnp.sum(x - x @ w)
    # bf16 MXU operands -> slightly looser tolerance vs. the pure-f32 reference.
    assert jnp.allclose(loss, ref, rtol=2e-2, atol=0.25), (loss, ref)

    # --- ragged, multi-tile, 2-partition path (exercises gated masking,
    #     per-partition partials and the deferred reduce) ---------------------
    M2 = 200
    x2 = jax.random.normal(kx2, (M2, D), dtype=jnp.float32)
    loss2 = elocal_loss(x2, w, tm=64)        # 4 tiles -> 2 partitions, ragged
    jax.block_until_ready(loss2)
    ref2 = jnp.sum(x2 - x2 @ w)
    assert jnp.allclose(loss2, ref2, rtol=2e-2, atol=0.5), (loss2, ref2)

    # --- exact path: f32 matmul operands reproduce the f32 reference tightly -
    loss3 = elocal_loss(x, w, matmul_dtype=jnp.float32)
    jax.block_until_ready(loss3)
    assert jnp.allclose(loss3, ref, rtol=1e-3, atol=1e-2), (loss3, ref)

    print("KERNEL_OK")
</pallas_src>

<mosaic_0001>
module attributes {stable_mosaic.version = 11 : i64} {
  func.func @_eloc_kernel(%arg0: i32, %arg1: i32, %arg2: memref<64x128xf32, #tpu.memory_space<vmem>>, %arg3: memref<128x128xbf16, #tpu.memory_space<vmem>>, %arg4: memref<1x8x128xf32, #tpu.memory_space<vmem>>, %arg5: memref<8x128xf32, #tpu.memory_space<vmem>>) attributes {dimension_semantics = [#tpu.dimension_semantics<parallel>, #tpu.dimension_semantics<arbitrary>], iteration_bounds = array<i64: 1, 1>, scalar_prefetch = 0 : i64, scratch_operands = 1 : i64, tpu.core_type = #tpu.core_type<tc>, window_params = [{transform_indices = @transform_0, window_bounds = array<i64: 64, 128>}, {pipeline_mode = #tpu.pipeline_mode<synchronous>, transform_indices = @transform_1, window_bounds = array<i64: 128, 128>}, {transform_indices = @transform_2, window_bounds = array<i64: 1, 8, 128>}]} {
    %c0_i32 = arith.constant 0 : i32
    %0 = arith.cmpi eq, %arg1, %c0_i32 : i32
    %1 = arith.extui %0 : i1 to i32
    %c0_i32_0 = arith.constant 0 : i32
    %2 = arith.cmpi ne, %1, %c0_i32_0 : i32
    scf.if %2 {
      %cst_11 = arith.constant 0.000000e+00 : f32
      %16 = vector.broadcast %cst_11 : f32 to vector<8x128xf32>
      %c0_12 = arith.constant 0 : index
      %c0_13 = arith.constant 0 : index
      %17 = vector.load %arg5[%c0_12, %c0_13] : memref<8x128xf32, #tpu.memory_space<vmem>>, vector<8x128xf32>
      tpu.vector_store %arg5[%c0_12, %c0_13], %16 {strides = array<i32>} : memref<8x128xf32, #tpu.memory_space<vmem>>, vector<8x128xf32>,
    } else {
    }
    %c0 = arith.constant 0 : index
    %c0_1 = arith.constant 0 : index
    %3 = vector.load %arg2[%c0, %c0_1] : memref<64x128xf32, #tpu.memory_space<vmem>>, vector<64x128xf32>
    %4 = arith.truncf %3 : vector<64x128xf32> to vector<64x128xbf16>
    %c0_2 = arith.constant 0 : index
    %c0_3 = arith.constant 0 : index
    %5 = vector.load %arg3[%c0_2, %c0_3] : memref<128x128xbf16, #tpu.memory_space<vmem>>, vector<128x128xbf16>
    %cst = arith.constant dense<0.000000e+00> : vector<64x128xf32>
    %6 = tpu.matmul %4, %5, %cst {dimension_numbers = #tpu.dot_dimension_numbers<[1], [0], [0], [1], [0, 0, 1, 1], [], []>} : vector<64x128xbf16>, vector<128x128xbf16>, vector<64x128xf32> -> vector<64x128xf32>
    %7 = arith.subf %3, %6 : vector<64x128xf32>
    %c0_4 = arith.constant 0 : index
    %c0_5 = arith.constant 0 : index
    %8 = vector.load %arg5[%c0_4, %c0_5] : memref<8x128xf32, #tpu.memory_space<vmem>>, vector<8x128xf32>
    %9 = vector.shape_cast %7 : vector<64x128xf32> to vector<8x8x128xf32>
    %cst_6 = arith.constant dense<0.000000e+00> : vector<8x128xf32>
    %10 = vector.multi_reduction <add>, %9, %cst_6 [0] : vector<8x8x128xf32> to vector<8x128xf32>
    %11 = arith.addf %8, %10 : vector<8x128xf32>
    %c0_7 = arith.constant 0 : index
    %c0_8 = arith.constant 0 : index
    %12 = vector.load %arg5[%c0_7, %c0_8] : memref<8x128xf32, #tpu.memory_space<vmem>>, vector<8x128xf32>
    tpu.vector_store %arg5[%c0_7, %c0_8], %11 {strides = array<i32>} : memref<8x128xf32, #tpu.memory_space<vmem>>, vector<8x128xf32>,
    %c0_i32_9 = arith.constant 0 : i32
    %13 = arith.cmpi eq, %arg1, %c0_i32_9 : i32
    %14 = arith.extui %13 : i1 to i32
    %c0_i32_10 = arith.constant 0 : i32
    %15 = arith.cmpi ne, %14, %c0_i32_10 : i32
    scf.if %15 {
      %c0_11 = arith.constant 0 : index
      %c0_12 = arith.constant 0 : index
      %16 = vector.load %arg5[%c0_11, %c0_12] : memref<8x128xf32, #tpu.memory_space<vmem>>, vector<8x128xf32>
      %c0_13 = arith.constant 0 : index
      %c0_14 = arith.constant 0 : index
      %c0_15 = arith.constant 0 : index
      %17 = vector.load %arg4[%c0_13, %c0_14, %c0_15] : memref<1x8x128xf32, #tpu.memory_space<vmem>>, vector<1x8x128xf32>
      %18 = vector.shape_cast %17 : vector<1x8x128xf32> to vector<8x128xf32>
      %19 = vector.shape_cast %16 : vector<8x128xf32> to vector<1x8x128xf32>
      tpu.vector_store %arg4[%c0_13, %c0_14, %c0_15], %19 {strides = array<i32>} : memref<1x8x128xf32, #tpu.memory_space<vmem>>, vector<1x8x128xf32>,
    } else {
    }
    return
  }
  func.func @transform_0(%arg0: i32, %arg1: i32) -> (i32, i32) {
    %c1_i32 = arith.constant 1 : i32
    %0 = arith.muli %arg0, %c1_i32 : i32
    %1 = arith.addi %0, %arg1 : i32
    %c0_i32 = arith.constant 0 : i32
    %c0_i32_0 = arith.constant 0 : i32
    return %1, %c0_i32 : i32, i32
  }
  func.func @transform_1(%arg0: i32, %arg1: i32) -> (i32, i32) {
    %c0_i32 = arith.constant 0 : i32
    %c0_i32_0 = arith.constant 0 : i32
    %c0_i32_1 = arith.constant 0 : i32
    return %c0_i32, %c0_i32_0 : i32, i32
  }
  func.func @transform_2(%arg0: i32, %arg1: i32) -> (i32, i32, i32) {
    %c0_i32 = arith.constant 0 : i32
    %c0_i32_0 = arith.constant 0 : i32
    %c0_i32_1 = arith.constant 0 : i32
    return %arg0, %c0_i32, %c0_i32_0 : i32, i32, i32
  }
}

</mosaic_0001>

<bundles_post_ra>
// kernel: tpu_custom_call.1
= control target key start
LH: loop header
LB: loop body
LE: loop exit
PB: predicated region body
PF: predicated region fallthrough
CT: control target
= control target key end

     0   :  { %7 = vsyncpa [#allocation4], 0  ;;  %s381_s0 = inlined_call_operand.hbm [shape: f32[64,128], index: 0, kind: input, shape index: {}]   ;;  %s382_s1 = inlined_call_operand.hbm [shape: bf16[128,128], index: 1, kind: input, shape index: {}]   ;;  %s383_s2 = inlined_call_operand.hbm [shape: f32[1,8,128], index: 2, kind: output, shape index: {}]  }
   0x1   :  { %8 = vsyncpa [#allocation7], 0 }
   0x2   :  { %9 = vsyncpa [#allocation5], 0  ;;  %s18_s11 = sshll.u32 %s381_s0, 4  ;;  %s350_s12 = smov [#allocation3]   ;;  %s19_s11 = int_to_ptr.hbm [resolvable:$true] %s18_s11 }
   0x3   :  { %s20_s13 = sshll.u32 %s350_s12, 4  ;;  %s31_s16 = sshll.u32 %s382_s1, 4  ;;  %s21_s13 = int_to_ptr.vmem [resolvable:$true] %s20_s13  ;;  %s32_s16 = int_to_ptr.hbm [resolvable:$true] %s31_s16 }
   0x4   :  { %s351_s17 = smov 128   ;;  %s352_s18 = smov 8  }
   0x5   :  { %26 = dma.hbm_to_vmem [thread:$0]  %s19_s11, 1024, %s21_s13, [#allocation4], %s351_s17, %s351_s17, %s352_s18  }
   0x6   :  { %s353_s19 = smov [#allocation6]   ;;  %s354_s21 = smov 64  }
   0x7   :  { %s33_s20 = sshll.u32 %s353_s19, 4  ;;  %s355_s22 = smov 4   ;;  %s34_s20 = int_to_ptr.vmem [resolvable:$true] %s33_s20 }
   0x8   :  { %39 = dma.hbm_to_vmem [thread:$0]  %s32_s16, 1024, %s34_s20, [#allocation7], %s354_s21, %s354_s21, %s355_s22  }
   0x9   :  { %344 = dma.done.wait [#allocation4], 1024  }
   0xa   :  { %345 = vsyncadd [#allocation4], 4294966272 }
   0xb   :  { %346 = dma.done.wait [#allocation7], 1024  }
   0xc   :  { %347 = vsyncadd [#allocation7], 4294966272  ;;  %v240_v0 = vld [vmem:[#allocation6 + $0x38] sm:$0xff]  ;;  %v239_v1 = vld [vmem:[#allocation6 + $0x30] sm:$0xff]  ;;  %s356_s0 = smov [#allocation8]   ;;  %s190_s25 = sshll.u32 %s383_s2, 4  ;;  %s191_s25 = int_to_ptr.hbm [resolvable:$true] %s190_s25 }
   0xd   :  { %131 = vmatpush.bf16.msra.mxu0 %v240_v0  ;;  %241 = vmatpush.bf16.msra.mxu1 %v240_v0  ;;  %v238_v2 = vld [vmem:[#allocation6 + $0x28] sm:$0xff]  ;;  %v237_v3 = vld [vmem:[#allocation6 + $0x20] sm:$0xff]  ;;  %v236_v4 = vld [vmem:[#allocation6 + $0x18] sm:$0xff]  ;;  %s188_s1 = sshll.u32 %s356_s0, 4  ;;  %s189_s1 = int_to_ptr.vmem [resolvable:$true] %s188_s1 }
   0xe   :  { %242 = vmatpush.bf16.msra.mxu2 %v240_v0  ;;  %243 = vmatpush.bf16.msra.mxu3 %v240_v0  ;;  %v235_v5 = vld [vmem:[#allocation6 + $0x10] sm:$0xff]  ;;  %v234_v6 = vld [vmem:[#allocation6 + $0x8] sm:$0xff]  ;;  %v233_v7 = vld [vmem:[#allocation6] sm:$0xff] }
   0xf   :  { %v55_v8 = vld [vmem:[#allocation3] sm:$0xff]  ;;  %v56_v9 = vld [vmem:[#allocation3 + $0x8] sm:$0xff]  ;;  %v57_v10 = vld [vmem:[#allocation3 + $0x10] sm:$0xff] }
  0x10   :  { %v58_v11 = vld [vmem:[#allocation3 + $0x18] sm:$0xff]  ;;  %v59_v12 = vld [vmem:[#allocation3 + $0x20] sm:$0xff]  ;;  %v60_v13 = vld [vmem:[#allocation3 + $0x28] sm:$0xff]  ;;  %v63_v16 = vpack.c.bf16 %v56_v9, %v55_v8 }
  0x11   :  { %132 = vmatpush.bf16.msra.mxu0 %v239_v1  ;;  %244 = vmatpush.bf16.msra.mxu1 %v239_v1  ;;  %v61_v14 = vld [vmem:[#allocation3 + $0x30] sm:$0xff]  ;;  %v62_v15 = vld [vmem:[#allocation3 + $0x38] sm:$0xff]  ;;  %v64_v17 = vpack.c.bf16 %v58_v11, %v57_v10  ;;  %v65_v18 = vpack.c.bf16 %v60_v13, %v59_v12 }
  0x12   :  { %245 = vmatpush.bf16.msra.mxu2 %v239_v1  ;;  %246 = vmatpush.bf16.msra.mxu3 %v239_v1  ;;  %v66_v19 = vpack.c.bf16 %v62_v15, %v61_v14 }
  0x15   :  { %133 = vmatpush.bf16.msra.mxu0 %v238_v2  ;;  %247 = vmatpush.bf16.msra.mxu1 %v238_v2 }
  0x16   :  { %248 = vmatpush.bf16.msra.mxu2 %v238_v2  ;;  %249 = vmatpush.bf16.msra.mxu3 %v238_v2 }
  0x19   :  { %134 = vmatpush.bf16.msra.mxu0 %v237_v3  ;;  %250 = vmatpush.bf16.msra.mxu1 %v237_v3 }
  0x1a   :  { %251 = vmatpush.bf16.msra.mxu2 %v237_v3  ;;  %252 = vmatpush.bf16.msra.mxu3 %v237_v3 }
  0x1d   :  { %135 = vmatpush.bf16.msra.mxu0 %v236_v4  ;;  %253 = vmatpush.bf16.msra.mxu1 %v236_v4 }
  0x1e   :  { %254 = vmatpush.bf16.msra.mxu2 %v236_v4  ;;  %255 = vmatpush.bf16.msra.mxu3 %v236_v4 }
  0x21   :  { %136 = vmatpush.bf16.msra.mxu0 %v235_v5  ;;  %256 = vmatpush.bf16.msra.mxu1 %v235_v5 }
  0x22   :  { %257 = vmatpush.bf16.msra.mxu2 %v235_v5  ;;  %258 = vmatpush.bf16.msra.mxu3 %v235_v5 }
  0x25   :  { %137 = vmatpush.bf16.msra.mxu0 %v234_v6  ;;  %259 = vmatpush.bf16.msra.mxu1 %v234_v6 }
  0x26   :  { %260 = vmatpush.bf16.msra.mxu2 %v234_v6  ;;  %261 = vmatpush.bf16.msra.mxu3 %v234_v6 }
  0x29   :  { %138 = vmatpush.bf16.msra.mxu0 %v233_v7  ;;  %262 = vmatpush.bf16.msra.mxu1 %v233_v7 }
  0x2a   :  { %263 = vmatpush.bf16.msra.mxu2 %v233_v7  ;;  %264 = vmatpush.bf16.msra.mxu3 %v233_v7 }
  0x2c   :  { %139 = vmatmul.bf16.vlgmr.msra.gmra.mxu0 %v63_v16  ;;  %144 = vmatmul.bf16.vlgmr.msra.gmra.mxu1 %v64_v17 }
  0x2d   :  { %149 = vmatmul.bf16.vlgmr.msra.gmra.mxu2 %v65_v18  ;;  %154 = vmatmul.bf16.vlgmr.msra.gmra.mxu3 %v66_v19 }
  0xa9   :  { %v140_v20 = vpop.f32.mrf.mxu0  ;;  %v145_v21 = vpop.f32.mrf.mxu1 }
  0xaa   :  { %v160_v25 = vsub.f32 %v55_v8, %v140_v20  ;;  %v162_v28 = vsub.f32 %v57_v10, %v145_v21 }
  0xb0   :  { %v150_v22 = vpop.f32.mrf.mxu2  ;;  %v155_v23 = vpop.f32.mrf.mxu3 }
  0xb1   :  { %v142_v24 = vpop.f32.mrf.mxu0  ;;  %v147_v27 = vpop.f32.mrf.mxu1  ;;  %v164_v32 = vsub.f32 %v59_v12, %v150_v22  ;;  %v166_v38 = vsub.f32 %v61_v14, %v155_v23 }
  0xb2   :  { %v161_v26 = vsub.f32 %v56_v9, %v142_v24  ;;  %v163_v30 = vsub.f32 %v58_v11, %v147_v27 }
  0xb4   :  { %v169_v29 = vadd.f32 %v161_v26, %v160_v25 }
  0xb6   :  { %v170_v31 = vadd.f32 %v169_v29, %v162_v28 }
  0xb8   :  { %v171_v33 = vadd.f32 %v170_v31, %v163_v30  ;;  %v152_v34 = vpop.f32.mrf.mxu2  ;;  %v157_v37 = vpop.f32.mrf.mxu3 }
  0xb9   :  { %v165_v35 = vsub.f32 %v60_v13, %v152_v34  ;;  %v167_v40 = vsub.f32 %v62_v15, %v157_v37 }
  0xba   :  { %v172_v36 = vadd.f32 %v171_v33, %v164_v32 }
  0xbc   :  { %v173_v39 = vadd.f32 %v172_v36, %v165_v35 }
  0xbe   :  { %v174_v41 = vadd.f32 %v173_v39, %v166_v38 }
  0xc0   :  { %v175_v42 = vadd.f32 %v174_v41, %v167_v40 }
  0xc2   :  { %182 = vst [vmem:[#allocation8] sm:$0xff] %v175_v42 }
  0xc3   :  { %193 = dma.vmem_to_hbm [thread:$0]  %s189_s1, 128, %s191_s25, [#allocation5]  }
  0xc4   :  { %348 = dma.done.wait [#allocation5], 128  }
  0xc5   :  { %349 = vsyncadd [#allocation5], 4294967168 }
  0xc6   :  { %198 = vsyncpa [#allocation4], 1 }
  0xc7   :  { %199 = vsyncpa [#allocation7], 1 }
  0xc8   :  { %200 = vsyncpa [#allocation5], 1 }

</bundles_post_ra>
